<compile_context>
chip_gen: v6e
topology: v6e:2x2x1
jax: 0.10.0
libtpu: 0.0.40
codegen_flags: <defaults>
</compile_context>

<pallas_src>
import functools
import math

import jax
import jax.numpy as jnp
from jax.experimental import pallas as pl
from jax.experimental.pallas import tpu as pltpu

# ------------------------- configuration -------------------------
BATCH = 2
SEQ = 8
HIDDEN = 32
NUM_HEADS = 2
HEAD_DIM = HIDDEN // NUM_HEADS
C_PARAM = 5                      # config['c']
C_KEEP = C_PARAM // 2 + 1        # rfft bins kept by the low-pass filter
ALPHA = 0.7                      # config['alpha']
LN_EPS = 1e-12
INV_SQRT_HD = 1.0 / math.sqrt(HEAD_DIM)


def _layer_norm(x, gamma, beta):
    mean = jnp.mean(x, axis=-1, keepdims=True)
    var = jnp.mean((x - mean) ** 2, axis=-1, keepdims=True)
    return (x - mean) * jax.lax.rsqrt(var + LN_EPS) * gamma + beta


def _bsarec_kernel(x_ref, mask_ref, lp_ref, wqkv_ref, wo_ref, pp_ref,
                   o_ref, ctx_ref, *, alpha):
    """One batch element per grid step: x_ref (S, H), mask_ref (S, S)."""
    x = x_ref[...]                       # (S, H)

    # ---- unpack the packed per-channel parameter block (one DMA) ----
    pp = pp_ref[...]                     # (8, 3H)
    bqkv   = pp[0:1, :]                  # (1, 3H)
    bo     = pp[1:2, :HIDDEN]            # (1, H)
    attn_g = pp[2:3, :HIDDEN]
    attn_b = pp[3:4, :HIDDEN]
    filt_g = pp[4:5, :HIDDEN]
    filt_b = pp[5:6, :HIDDEN]
    beta2  = pp[6:7, :HIDDEN]            # sqrt_beta ** 2 (precomputed on host)

    # ---------------- FrequencyLayer branch (dsp) ----------------
    low = jnp.dot(lp_ref[...], x, preferred_element_type=jnp.float32)   # (S, H)
    high = x - low
    seq_fft = low + beta2 * high
    dsp = _layer_norm(seq_fft + x, filt_g, filt_b)

    # ---------------- MultiHeadAttention branch (gsp) ----------------
    qkv = jnp.dot(x, wqkv_ref[...], preferred_element_type=jnp.float32) + bqkv
    mask = mask_ref[...]                 # (S, S) additive
    for h in range(NUM_HEADS):           # tiny static loop; everything stays 2D
        lo = h * HEAD_DIM
        qh = qkv[:, lo:lo + HEAD_DIM]
        kh = qkv[:, HIDDEN + lo:HIDDEN + lo + HEAD_DIM]
        vh = qkv[:, 2 * HIDDEN + lo:2 * HIDDEN + lo + HEAD_DIM]

        # Q @ K^T: contract the last dim of both operands -> no transpose.
        scores = jax.lax.dot_general(
            qh, kh, (((1,), (1,)), ((), ())),
            preferred_element_type=jnp.float32)                  # (S, S)
        scores = scores * INV_SQRT_HD + mask

        m = jnp.max(scores, axis=-1, keepdims=True)
        e = jnp.exp(scores - m)
        probs = e * pl.reciprocal(jnp.sum(e, axis=-1, keepdims=True), approx=True)

        # Write this head's context into the scratch at its lane offset so the
        # output projection is a single full-width matmul afterwards.
        ctx_ref[:, lo:lo + HEAD_DIM] = jnp.dot(
            probs, vh, preferred_element_type=jnp.float32)       # (S, hd)

    attn = jnp.dot(ctx_ref[...], wo_ref[...],
                   preferred_element_type=jnp.float32) + bo + x   # (S, H)
    gsp = _layer_norm(attn, attn_g, attn_b)

    o_ref[...] = (alpha * dsp + (1.0 - alpha) * gsp).astype(o_ref.dtype)


def _lowpass_matrix(seq_len, c_keep, dtype=jnp.float32):
    """(S, S) matrix equivalent to rfft -> zero bins >= c_keep -> irfft (ortho)."""
    eye = jnp.eye(seq_len, dtype=dtype)
    fr = jnp.fft.rfft(eye, axis=0, norm="ortho")
    fr = fr.at[c_keep:, :].set(0)
    return jnp.fft.irfft(fr, n=seq_len, axis=0, norm="ortho").astype(dtype)


def make_bsarec_layer(params, *, seq_len=SEQ, c_keep=C_KEEP, alpha=ALPHA):
    """Precompute everything once, return a jitted forward(x, attention_mask)."""
    H = HIDDEN

    # ---- one-time host-side preprocessing (hoisted out of the call path) ----
    lp = _lowpass_matrix(seq_len, c_keep)                               # (S, S)

    wqkv_t = jnp.concatenate(
        [params["wq"].T, params["wk"].T, params["wv"].T], axis=1)       # (H, 3H)
    wo_t = params["wo"].T                                               # (H, H)

    bqkv = jnp.concatenate([params["bq"], params["bk"], params["bv"]])  # (3H,)
    packed = jnp.zeros((8, 3 * H), jnp.float32)
    packed = packed.at[0, :].set(bqkv)
    packed = packed.at[1, :H].set(params["bo"])
    packed = packed.at[2, :H].set(params["attn_gamma"])
    packed = packed.at[3, :H].set(params["attn_beta"])
    packed = packed.at[4, :H].set(params["filt_gamma"])
    packed = packed.at[5, :H].set(params["filt_beta"])
    packed = packed.at[6, :H].set((params["sqrt_beta"] ** 2).reshape(-1))

    kernel = functools.partial(_bsarec_kernel, alpha=float(alpha))

    @jax.jit
    def forward(x, attention_mask):
        B, S, Hd = x.shape
        mask = attention_mask.reshape(B, S, S).astype(jnp.float32)      # heads share it

        return pl.pallas_call(
            kernel,
            out_shape=jax.ShapeDtypeStruct((B, S, Hd), jnp.float32),
            grid=(B,),                               # one batch element per step
            in_specs=[
                pl.BlockSpec((None, S, Hd), lambda b: (b, 0, 0)),        # x  (S, H)
                pl.BlockSpec((None, S, S), lambda b: (b, 0, 0)),         # mask (S, S)
                pl.BlockSpec((S, S), lambda b: (0, 0)),                  # low-pass op (shared)
                pl.BlockSpec((Hd, 3 * Hd), lambda b: (0, 0)),            # fused W_qkv^T
                pl.BlockSpec((Hd, Hd), lambda b: (0, 0)),                # W_o^T
                pl.BlockSpec((8, 3 * Hd), lambda b: (0, 0)),             # packed small params
            ],
            out_specs=pl.BlockSpec((None, S, Hd), lambda b: (b, 0, 0)),
            scratch_shapes=[pltpu.VMEM((S, Hd), jnp.float32)],           # head-context slab
            compiler_params=pltpu.CompilerParams(
                dimension_semantics=("parallel",)),                      # v7x: 2 TCs
        )(x, mask, lp, wqkv_t, wo_t, packed)

    return forward


def _reference(x, attention_mask, params, *, c_keep=C_KEEP, alpha=ALPHA):
    """Pure-JAX reference mirroring the PyTorch BSARecLayer forward (eval mode)."""
    B, S, H = x.shape

    def ln(t, g, b):
        u = jnp.mean(t, axis=-1, keepdims=True)
        s = jnp.mean((t - u) ** 2, axis=-1, keepdims=True)
        return (t - u) / jnp.sqrt(s + LN_EPS) * g + b

    # FrequencyLayer
    xf = jnp.fft.rfft(x, axis=1, norm="ortho")
    xf = xf.at[:, c_keep:, :].set(0)
    low = jnp.fft.irfft(xf, n=S, axis=1, norm="ortho")
    high = x - low
    seq_fft = low + (params["sqrt_beta"] ** 2) * high
    dsp = ln(seq_fft + x, params["filt_gamma"], params["filt_beta"])

    # MultiHeadAttention
    q = x @ params["wq"].T + params["bq"]
    k = x @ params["wk"].T + params["bk"]
    v = x @ params["wv"].T + params["bv"]

    def split(t):
        return t.reshape(B, S, NUM_HEADS, HEAD_DIM).transpose(0, 2, 1, 3)

    qh, kh, vh = split(q), split(k), split(v)
    scores = jnp.einsum("bhqd,bhkd->bhqk", qh, kh) * INV_SQRT_HD + attention_mask
    probs = jax.nn.softmax(scores, axis=-1)
    ctx = jnp.einsum("bhqk,bhkd->bhqd", probs, vh)
    ctx = ctx.transpose(0, 2, 1, 3).reshape(B, S, H)
    hidden = ctx @ params["wo"].T + params["bo"] + x
    gsp = ln(hidden, params["attn_gamma"], params["attn_beta"])

    return alpha * dsp + (1.0 - alpha) * gsp


if __name__ == "__main__":
    key = jax.random.PRNGKey(0)
    keys = jax.random.split(key, 16)
    scale = 1.0 / math.sqrt(HIDDEN)
    params = {
        "wq": jax.random.uniform(keys[0], (HIDDEN, HIDDEN), jnp.float32, -scale, scale),
        "bq": jax.random.uniform(keys[1], (HIDDEN,), jnp.float32, -scale, scale),
        "wk": jax.random.uniform(keys[2], (HIDDEN, HIDDEN), jnp.float32, -scale, scale),
        "bk": jax.random.uniform(keys[3], (HIDDEN,), jnp.float32, -scale, scale),
        "wv": jax.random.uniform(keys[4], (HIDDEN, HIDDEN), jnp.float32, -scale, scale),
        "bv": jax.random.uniform(keys[5], (HIDDEN,), jnp.float32, -scale, scale),
        "wo": jax.random.uniform(keys[6], (HIDDEN, HIDDEN), jnp.float32, -scale, scale),
        "bo": jax.random.uniform(keys[7], (HIDDEN,), jnp.float32, -scale, scale),
        "attn_gamma": 1.0 + 0.1 * jax.random.normal(keys[8], (HIDDEN,), jnp.float32),
        "attn_beta": 0.1 * jax.random.normal(keys[9], (HIDDEN,), jnp.float32),
        "filt_gamma": 1.0 + 0.1 * jax.random.normal(keys[10], (HIDDEN,), jnp.float32),
        "filt_beta": 0.1 * jax.random.normal(keys[11], (HIDDEN,), jnp.float32),
        "sqrt_beta": jax.random.normal(keys[12], (1, 1, HIDDEN), jnp.float32),
    }

    x = jax.random.normal(keys[13], (BATCH, SEQ, HIDDEN), jnp.float32)

    # Additive attention mask (B, 1, S, S): causal + per-batch key padding.
    causal = jnp.tril(jnp.ones((SEQ, SEQ), jnp.float32))
    lengths = jnp.array([SEQ, SEQ - 2])
    key_valid = (jnp.arange(SEQ)[None, :] < lengths[:, None]).astype(jnp.float32)  # (B, S)
    visible = causal[None, :, :] * key_valid[:, None, :]                           # (B, S, S)
    mask = ((1.0 - visible) * -1e9)[:, None, :, :]                                 # (B, 1, S, S)

    bsarec = make_bsarec_layer(params)       # one-time host prep + jitted forward
    out = bsarec(x, mask)
    out = jax.block_until_ready(out)

    ref = _reference(x, mask, params)
    assert out.shape == ref.shape
    assert bool(jnp.all(jnp.isfinite(out))), "non-finite output"
    assert bool(jnp.allclose(out, ref, atol=1e-3, rtol=1e-3)), "mismatch vs reference"

    print("KERNEL_OK")
</pallas_src>

<mosaic_0001>
module attributes {stable_mosaic.version = 11 : i64} {
  func.func @_bsarec_kernel(%arg0: i32, %arg1: memref<1x8x32xf32, #tpu.memory_space<vmem>>, %arg2: memref<1x8x8xf32, #tpu.memory_space<vmem>>, %arg3: memref<8x8xf32, #tpu.memory_space<vmem>>, %arg4: memref<32x96xf32, #tpu.memory_space<vmem>>, %arg5: memref<32x32xf32, #tpu.memory_space<vmem>>, %arg6: memref<8x96xf32, #tpu.memory_space<vmem>>, %arg7: memref<1x8x32xf32, #tpu.memory_space<vmem>>, %arg8: memref<8x32xf32, #tpu.memory_space<vmem>>) attributes {dimension_semantics = [#tpu.dimension_semantics<parallel>], iteration_bounds = array<i64: 2>, scalar_prefetch = 0 : i64, scratch_operands = 1 : i64, tpu.core_type = #tpu.core_type<tc>, window_params = [{transform_indices = @transform_0, window_bounds = array<i64: 1, 8, 32>}, {transform_indices = @transform_1, window_bounds = array<i64: 1, 8, 8>}, {pipeline_mode = #tpu.pipeline_mode<synchronous>, transform_indices = @transform_2, window_bounds = array<i64: 8, 8>}, {pipeline_mode = #tpu.pipeline_mode<synchronous>, transform_indices = @transform_3, window_bounds = array<i64: 32, 96>}, {pipeline_mode = #tpu.pipeline_mode<synchronous>, transform_indices = @transform_4, window_bounds = array<i64: 32, 32>}, {pipeline_mode = #tpu.pipeline_mode<synchronous>, transform_indices = @transform_5, window_bounds = array<i64: 8, 96>}, {transform_indices = @transform_6, window_bounds = array<i64: 1, 8, 32>}]} {
    %c0 = arith.constant 0 : index
    %c0_0 = arith.constant 0 : index
    %c0_1 = arith.constant 0 : index
    %0 = vector.load %arg1[%c0, %c0_0, %c0_1] : memref<1x8x32xf32, #tpu.memory_space<vmem>>, vector<1x8x32xf32>
    %1 = vector.shape_cast %0 : vector<1x8x32xf32> to vector<8x32xf32>
    %c0_2 = arith.constant 0 : index
    %c0_3 = arith.constant 0 : index
    %2 = vector.load %arg6[%c0_2, %c0_3] : memref<8x96xf32, #tpu.memory_space<vmem>>, vector<8x96xf32>
    %3 = vector.extract_strided_slice %2 {offsets = [0, 0], sizes = [1, 96], strides = [1, 1]} : vector<8x96xf32> to vector<1x96xf32>
    %4 = vector.extract_strided_slice %2 {offsets = [1, 0], sizes = [1, 32], strides = [1, 1]} : vector<8x96xf32> to vector<1x32xf32>
    %5 = vector.extract_strided_slice %2 {offsets = [2, 0], sizes = [1, 32], strides = [1, 1]} : vector<8x96xf32> to vector<1x32xf32>
    %6 = vector.extract_strided_slice %2 {offsets = [3, 0], sizes = [1, 32], strides = [1, 1]} : vector<8x96xf32> to vector<1x32xf32>
    %7 = vector.extract_strided_slice %2 {offsets = [4, 0], sizes = [1, 32], strides = [1, 1]} : vector<8x96xf32> to vector<1x32xf32>
    %8 = vector.extract_strided_slice %2 {offsets = [5, 0], sizes = [1, 32], strides = [1, 1]} : vector<8x96xf32> to vector<1x32xf32>
    %9 = vector.extract_strided_slice %2 {offsets = [6, 0], sizes = [1, 32], strides = [1, 1]} : vector<8x96xf32> to vector<1x32xf32>
    %c0_4 = arith.constant 0 : index
    %c0_5 = arith.constant 0 : index
    %10 = vector.load %arg3[%c0_4, %c0_5] : memref<8x8xf32, #tpu.memory_space<vmem>>, vector<8x8xf32>
    %cst = arith.constant dense<0.000000e+00> : vector<8x32xf32>
    %11 = tpu.matmul %10, %1, %cst {dimension_numbers = #tpu.dot_dimension_numbers<[1], [0], [0], [1], [0, 0, 1, 1], [], []>} : vector<8x8xf32>, vector<8x32xf32>, vector<8x32xf32> -> vector<8x32xf32>
    %12 = arith.subf %1, %11 : vector<8x32xf32>
    %13 = vector.broadcast %9 : vector<1x32xf32> to vector<8x32xf32>
    %14 = arith.mulf %13, %12 : vector<8x32xf32>
    %15 = arith.addf %11, %14 : vector<8x32xf32>
    %16 = arith.addf %15, %1 : vector<8x32xf32>
    %cst_6 = arith.constant dense<0.000000e+00> : vector<8xf32>
    %17 = vector.multi_reduction <add>, %16, %cst_6 [1] : vector<8x32xf32> to vector<8xf32>
    %18 = vector.shape_cast %17 : vector<8xf32> to vector<8x1xf32>
    %cst_7 = arith.constant 3.200000e+01 : f32
    %19 = vector.broadcast %cst_7 : f32 to vector<8x1xf32>
    %20 = arith.divf %18, %19 : vector<8x1xf32>
    %21 = vector.broadcast %20 : vector<8x1xf32> to vector<8x32xf32>
    %22 = arith.subf %16, %21 : vector<8x32xf32>
    %23 = arith.mulf %22, %22 : vector<8x32xf32>
    %cst_8 = arith.constant dense<0.000000e+00> : vector<8xf32>
    %24 = vector.multi_reduction <add>, %23, %cst_8 [1] : vector<8x32xf32> to vector<8xf32>
    %25 = vector.shape_cast %24 : vector<8xf32> to vector<8x1xf32>
    %cst_9 = arith.constant 3.200000e+01 : f32
    %26 = vector.broadcast %cst_9 : f32 to vector<8x1xf32>
    %27 = arith.divf %25, %26 : vector<8x1xf32>
    %28 = vector.broadcast %20 : vector<8x1xf32> to vector<8x32xf32>
    %29 = arith.subf %16, %28 : vector<8x32xf32>
    %cst_10 = arith.constant 9.99999996E-13 : f32
    %30 = vector.broadcast %cst_10 : f32 to vector<8x1xf32>
    %31 = arith.addf %27, %30 : vector<8x1xf32>
    %32 = math.rsqrt %31 : vector<8x1xf32>
    %33 = vector.broadcast %32 : vector<8x1xf32> to vector<8x32xf32>
    %34 = arith.mulf %29, %33 : vector<8x32xf32>
    %35 = vector.broadcast %7 : vector<1x32xf32> to vector<8x32xf32>
    %36 = arith.mulf %34, %35 : vector<8x32xf32>
    %37 = vector.broadcast %8 : vector<1x32xf32> to vector<8x32xf32>
    %38 = arith.addf %36, %37 : vector<8x32xf32>
    %c0_11 = arith.constant 0 : index
    %c0_12 = arith.constant 0 : index
    %39 = vector.load %arg4[%c0_11, %c0_12] : memref<32x96xf32, #tpu.memory_space<vmem>>, vector<32x96xf32>
    %cst_13 = arith.constant dense<0.000000e+00> : vector<8x96xf32>
    %40 = tpu.matmul %1, %39, %cst_13 {dimension_numbers = #tpu.dot_dimension_numbers<[1], [0], [0], [1], [0, 0, 1, 1], [], []>} : vector<8x32xf32>, vector<32x96xf32>, vector<8x96xf32> -> vector<8x96xf32>
    %41 = vector.broadcast %3 : vector<1x96xf32> to vector<8x96xf32>
    %42 = arith.addf %40, %41 : vector<8x96xf32>
    %c0_14 = arith.constant 0 : index
    %c0_15 = arith.constant 0 : index
    %c0_16 = arith.constant 0 : index
    %43 = vector.load %arg2[%c0_14, %c0_15, %c0_16] : memref<1x8x8xf32, #tpu.memory_space<vmem>>, vector<1x8x8xf32>
    %44 = vector.shape_cast %43 : vector<1x8x8xf32> to vector<8x8xf32>
    %45 = vector.extract_strided_slice %42 {offsets = [0, 0], sizes = [8, 16], strides = [1, 1]} : vector<8x96xf32> to vector<8x16xf32>
    %46 = vector.extract_strided_slice %42 {offsets = [0, 32], sizes = [8, 16], strides = [1, 1]} : vector<8x96xf32> to vector<8x16xf32>
    %47 = vector.extract_strided_slice %42 {offsets = [0, 64], sizes = [8, 16], strides = [1, 1]} : vector<8x96xf32> to vector<8x16xf32>
    %cst_17 = arith.constant dense<0.000000e+00> : vector<8x8xf32>
    %48 = tpu.matmul %45, %46, %cst_17 {dimension_numbers = #tpu.dot_dimension_numbers<[1], [1], [0], [0], [0, 0, 1, 0], [], []>} : vector<8x16xf32>, vector<8x16xf32>, vector<8x8xf32> -> vector<8x8xf32>
    %cst_18 = arith.constant 2.500000e-01 : f32
    %49 = vector.broadcast %cst_18 : f32 to vector<8x8xf32>
    %50 = arith.mulf %48, %49 : vector<8x8xf32>
    %51 = arith.addf %50, %44 : vector<8x8xf32>
    %cst_19 = arith.constant dense<0xFF800000> : vector<8xf32>
    %52 = vector.multi_reduction <maximumf>, %51, %cst_19 [1] : vector<8x8xf32> to vector<8xf32>
    %53 = vector.shape_cast %52 : vector<8xf32> to vector<8x1xf32>
    %54 = vector.broadcast %53 : vector<8x1xf32> to vector<8x8xf32>
    %55 = arith.subf %51, %54 : vector<8x8xf32>
    %56 = math.exp %55 : vector<8x8xf32>
    %cst_20 = arith.constant dense<0.000000e+00> : vector<8xf32>
    %57 = vector.multi_reduction <add>, %56, %cst_20 [1] : vector<8x8xf32> to vector<8xf32>
    %58 = vector.shape_cast %57 : vector<8xf32> to vector<8x1xf32>
    %59 = tpu.reciprocal %58 {approx = true} : vector<8x1xf32> -> vector<8x1xf32>
    %60 = vector.broadcast %59 : vector<8x1xf32> to vector<8x8xf32>
    %61 = arith.mulf %56, %60 : vector<8x8xf32>
    %cst_21 = arith.constant dense<0.000000e+00> : vector<8x16xf32>
    %62 = tpu.matmul %61, %47, %cst_21 {dimension_numbers = #tpu.dot_dimension_numbers<[1], [0], [0], [1], [0, 0, 1, 1], [], []>} : vector<8x8xf32>, vector<8x16xf32>, vector<8x16xf32> -> vector<8x16xf32>
    %c0_22 = arith.constant 0 : index
    %c0_23 = arith.constant 0 : index
    %63 = vector.load %arg8[%c0_22, %c0_23] : memref<8x32xf32, #tpu.memory_space<vmem>>, vector<8x16xf32>
    tpu.vector_store %arg8[%c0_22, %c0_23], %62 {strides = array<i32>} : memref<8x32xf32, #tpu.memory_space<vmem>>, vector<8x16xf32>,
    %64 = vector.extract_strided_slice %42 {offsets = [0, 16], sizes = [8, 16], strides = [1, 1]} : vector<8x96xf32> to vector<8x16xf32>
    %65 = vector.extract_strided_slice %42 {offsets = [0, 48], sizes = [8, 16], strides = [1, 1]} : vector<8x96xf32> to vector<8x16xf32>
    %66 = vector.extract_strided_slice %42 {offsets = [0, 80], sizes = [8, 16], strides = [1, 1]} : vector<8x96xf32> to vector<8x16xf32>
    %cst_24 = arith.constant dense<0.000000e+00> : vector<8x8xf32>
    %67 = tpu.matmul %64, %65, %cst_24 {dimension_numbers = #tpu.dot_dimension_numbers<[1], [1], [0], [0], [0, 0, 1, 0], [], []>} : vector<8x16xf32>, vector<8x16xf32>, vector<8x8xf32> -> vector<8x8xf32>
    %cst_25 = arith.constant 2.500000e-01 : f32
    %68 = vector.broadcast %cst_25 : f32 to vector<8x8xf32>
    %69 = arith.mulf %67, %68 : vector<8x8xf32>
    %70 = arith.addf %69, %44 : vector<8x8xf32>
    %cst_26 = arith.constant dense<0xFF800000> : vector<8xf32>
    %71 = vector.multi_reduction <maximumf>, %70, %cst_26 [1] : vector<8x8xf32> to vector<8xf32>
    %72 = vector.shape_cast %71 : vector<8xf32> to vector<8x1xf32>
    %73 = vector.broadcast %72 : vector<8x1xf32> to vector<8x8xf32>
    %74 = arith.subf %70, %73 : vector<8x8xf32>
    %75 = math.exp %74 : vector<8x8xf32>
    %cst_27 = arith.constant dense<0.000000e+00> : vector<8xf32>
    %76 = vector.multi_reduction <add>, %75, %cst_27 [1] : vector<8x8xf32> to vector<8xf32>
    %77 = vector.shape_cast %76 : vector<8xf32> to vector<8x1xf32>
    %78 = tpu.reciprocal %77 {approx = true} : vector<8x1xf32> -> vector<8x1xf32>
    %79 = vector.broadcast %78 : vector<8x1xf32> to vector<8x8xf32>
    %80 = arith.mulf %75, %79 : vector<8x8xf32>
    %cst_28 = arith.constant dense<0.000000e+00> : vector<8x16xf32>
    %81 = tpu.matmul %80, %66, %cst_28 {dimension_numbers = #tpu.dot_dimension_numbers<[1], [0], [0], [1], [0, 0, 1, 1], [], []>} : vector<8x8xf32>, vector<8x16xf32>, vector<8x16xf32> -> vector<8x16xf32>
    %c0_29 = arith.constant 0 : index
    %c16 = arith.constant 16 : index
    %82 = vector.load %arg8[%c0_29, %c16] : memref<8x32xf32, #tpu.memory_space<vmem>>, vector<8x16xf32>
    tpu.vector_store %arg8[%c0_29, %c16], %81 {strides = array<i32>} : memref<8x32xf32, #tpu.memory_space<vmem>>, vector<8x16xf32>,
    %c0_30 = arith.constant 0 : index
    %c0_31 = arith.constant 0 : index
    %83 = vector.load %arg8[%c0_30, %c0_31] : memref<8x32xf32, #tpu.memory_space<vmem>>, vector<8x32xf32>
    %c0_32 = arith.constant 0 : index
    %c0_33 = arith.constant 0 : index
    %84 = vector.load %arg5[%c0_32, %c0_33] : memref<32x32xf32, #tpu.memory_space<vmem>>, vector<32x32xf32>
    %cst_34 = arith.constant dense<0.000000e+00> : vector<8x32xf32>
    %85 = tpu.matmul %83, %84, %cst_34 {dimension_numbers = #tpu.dot_dimension_numbers<[1], [0], [0], [1], [0, 0, 1, 1], [], []>} : vector<8x32xf32>, vector<32x32xf32>, vector<8x32xf32> -> vector<8x32xf32>
    %86 = vector.broadcast %4 : vector<1x32xf32> to vector<8x32xf32>
    %87 = arith.addf %85, %86 : vector<8x32xf32>
    %88 = arith.addf %87, %1 : vector<8x32xf32>
    %cst_35 = arith.constant dense<0.000000e+00> : vector<8xf32>
    %89 = vector.multi_reduction <add>, %88, %cst_35 [1] : vector<8x32xf32> to vector<8xf32>
    %90 = vector.shape_cast %89 : vector<8xf32> to vector<8x1xf32>
    %cst_36 = arith.constant 3.200000e+01 : f32
    %91 = vector.broadcast %cst_36 : f32 to vector<8x1xf32>
    %92 = arith.divf %90, %91 : vector<8x1xf32>
    %93 = vector.broadcast %92 : vector<8x1xf32> to vector<8x32xf32>
    %94 = arith.subf %88, %93 : vector<8x32xf32>
    %95 = arith.mulf %94, %94 : vector<8x32xf32>
    %cst_37 = arith.constant dense<0.000000e+00> : vector<8xf32>
    %96 = vector.multi_reduction <add>, %95, %cst_37 [1] : vector<8x32xf32> to vector<8xf32>
    %97 = vector.shape_cast %96 : vector<8xf32> to vector<8x1xf32>
    %cst_38 = arith.constant 3.200000e+01 : f32
    %98 = vector.broadcast %cst_38 : f32 to vector<8x1xf32>
    %99 = arith.divf %97, %98 : vector<8x1xf32>
    %100 = vector.broadcast %92 : vector<8x1xf32> to vector<8x32xf32>
    %101 = arith.subf %88, %100 : vector<8x32xf32>
    %cst_39 = arith.constant 9.99999996E-13 : f32
    %102 = vector.broadcast %cst_39 : f32 to vector<8x1xf32>
    %103 = arith.addf %99, %102 : vector<8x1xf32>
    %104 = math.rsqrt %103 : vector<8x1xf32>
    %105 = vector.broadcast %104 : vector<8x1xf32> to vector<8x32xf32>
    %106 = arith.mulf %101, %105 : vector<8x32xf32>
    %107 = vector.broadcast %5 : vector<1x32xf32> to vector<8x32xf32>
    %108 = arith.mulf %106, %107 : vector<8x32xf32>
    %109 = vector.broadcast %6 : vector<1x32xf32> to vector<8x32xf32>
    %110 = arith.addf %108, %109 : vector<8x32xf32>
    %cst_40 = arith.constant 0.699999988 : f32
    %111 = vector.broadcast %cst_40 : f32 to vector<8x32xf32>
    %112 = arith.mulf %111, %38 : vector<8x32xf32>
    %cst_41 = arith.constant 3.000000e-01 : f32
    %113 = vector.broadcast %cst_41 : f32 to vector<8x32xf32>
    %114 = arith.mulf %113, %110 : vector<8x32xf32>
    %115 = arith.addf %112, %114 : vector<8x32xf32>
    %c0_42 = arith.constant 0 : index
    %c0_43 = arith.constant 0 : index
    %c0_44 = arith.constant 0 : index
    %116 = vector.load %arg7[%c0_42, %c0_43, %c0_44] : memref<1x8x32xf32, #tpu.memory_space<vmem>>, vector<1x8x32xf32>
    %117 = vector.shape_cast %116 : vector<1x8x32xf32> to vector<8x32xf32>
    %118 = vector.shape_cast %115 : vector<8x32xf32> to vector<1x8x32xf32>
    tpu.vector_store %arg7[%c0_42, %c0_43, %c0_44], %118 {strides = array<i32>} : memref<1x8x32xf32, #tpu.memory_space<vmem>>, vector<1x8x32xf32>,
    return
  }
  func.func @transform_0(%arg0: i32) -> (i32, i32, i32) {
    %c0_i32 = arith.constant 0 : i32
    %c0_i32_0 = arith.constant 0 : i32
    %c0_i32_1 = arith.constant 0 : i32
    return %arg0, %c0_i32, %c0_i32_0 : i32, i32, i32
  }
  func.func @transform_1(%arg0: i32) -> (i32, i32, i32) {
    %c0_i32 = arith.constant 0 : i32
    %c0_i32_0 = arith.constant 0 : i32
    %c0_i32_1 = arith.constant 0 : i32
    return %arg0, %c0_i32, %c0_i32_0 : i32, i32, i32
  }
  func.func @transform_2(%arg0: i32) -> (i32, i32) {
    %c0_i32 = arith.constant 0 : i32
    %c0_i32_0 = arith.constant 0 : i32
    %c0_i32_1 = arith.constant 0 : i32
    return %c0_i32, %c0_i32_0 : i32, i32
  }
  func.func @transform_3(%arg0: i32) -> (i32, i32) {
    %c0_i32 = arith.constant 0 : i32
    %c0_i32_0 = arith.constant 0 : i32
    %c0_i32_1 = arith.constant 0 : i32
    return %c0_i32, %c0_i32_0 : i32, i32
  }
  func.func @transform_4(%arg0: i32) -> (i32, i32) {
    %c0_i32 = arith.constant 0 : i32
    %c0_i32_0 = arith.constant 0 : i32
    %c0_i32_1 = arith.constant 0 : i32
    return %c0_i32, %c0_i32_0 : i32, i32
  }
  func.func @transform_5(%arg0: i32) -> (i32, i32) {
    %c0_i32 = arith.constant 0 : i32
    %c0_i32_0 = arith.constant 0 : i32
    %c0_i32_1 = arith.constant 0 : i32
    return %c0_i32, %c0_i32_0 : i32, i32
  }
  func.func @transform_6(%arg0: i32) -> (i32, i32, i32) {
    %c0_i32 = arith.constant 0 : i32
    %c0_i32_0 = arith.constant 0 : i32
    %c0_i32_1 = arith.constant 0 : i32
    return %arg0, %c0_i32, %c0_i32_0 : i32, i32, i32
  }
}

</mosaic_0001>

<bundles_post_ra>
// kernel: forward.1
= control target key start
LH: loop header
LB: loop body
LE: loop exit
PB: predicated region body
PF: predicated region fallthrough
CT: control target
= control target key end

     0   :  { %s1896_s0 = inlined_call_operand.hbm [shape: f32[2,8,32], index: 0, kind: input, shape index: {}]   ;;  %s1897_s1 = inlined_call_operand.hbm [shape: f32[2,8,8], index: 1, kind: input, shape index: {}]   ;;  %s1898_s2 = inlined_call_operand.hbm [shape: f32[8,8], index: 2, kind: input, shape index: {}]   ;;  %s1899_s3 = inlined_call_operand.hbm [shape: f32[32,96], index: 3, kind: input, shape index: {}]   ;;  %s1900_s4 = inlined_call_operand.hbm [shape: f32[32,32], index: 4, kind: input, shape index: {}]   ;;  %s1901_s5 = inlined_call_operand.vmem [shape: f32[8,96], index: 5, kind: input, shape index: {}]   ;;  %s1902_s6 = inlined_call_operand.hbm [shape: f32[2,8,32], index: 6, kind: output, shape index: {}]  }
   0x1   :  { %1907 = sst [smem:[#allocation18_spill]] %s1898_s2 }
   0x2   :  { %1908 = sst [smem:[#allocation19_spill]] %s1899_s3 }
   0x3   :  { %1909 = sst [smem:[#allocation20_spill]] %s1900_s4 }
   0x4   :  { %11 = vsyncpa [#allocation4], 0 }
   0x5   :  { %13 = vsyncpa [#allocation4 + $0x1], 0 }
   0x6   :  { %14 = vsyncpa [#allocation7], 0 }
   0x7   :  { %16 = vsyncpa [#allocation7 + $0x1], 0 }
   0x8   :  { %17 = vsyncpa [#allocation10], 0 }
   0x9   :  { %18 = vsyncpa [#allocation5], 0 }
   0xa   :  { %20 = vsyncpa [#allocation5 + $0x1], 0  ;;  %s1587_s21 = smov 0   ;;  %s1589_s22 = smov 0  }
   0xb   :  { %s1591_s23 = smov 0   ;;  %s1593_s24 = smov 0  }
   0xc LB: > { %s1608_s25 = sadd.s32 4294967295, %s1534_s24   ;;  %s1123_s26 = sadd.s32 4294967294, %s1534_s24   ;;  %s1534_s24 = sphi %s1593_s24, %s1932_s24   ;;  %s1530_s23 = sphi %s1591_s23, %s1931_s23   ;;  %s1526_s22 = sphi %s1589_s22, %s1930_s22   ;;  %s1522_s21 = sphi %s1587_s21, %s1929_s21  }
   0xd   : > { %p46_p0 = scmp.ne.s32.totalorder %s1526_s22, %s1522_s21  ;;  %p1903_p1 = scmp.eq.s32.totalorder %s1608_s25, 0 }
   0xe   : > { %p186_p3 = scmp.eq.s32.totalorder %s1123_s26, 1  ;;  %p1124_p5 = scmp.ge.s32.totalorder %s1534_s24, 1 }
   0xf   : > { %p1617_p4 = por %p1903_p1, %p46_p0  ;;  %p193_p7 = scmp.lt.s32.totalorder %s1534_s24, 3 }
  0x10   : > { %p1622_p6 = por %p186_p3, %p46_p0  ;;  %s1536_s30 = smov [#allocation8]  }
  0x11   : > { %s1910_s27 = scalar_select %p1617_p4, 1, 0 }
  0x12   : > { %s1911_s28 = scalar_select %p1622_p6, 1, 0 }
  0x13   : > { %p1627_p8 = pnand %p1124_p5, %p193_p7  ;;  %s206_s7 = sshll.u32 %s1536_s30, 4  ;;  %s207_s7 = int_to_ptr.vmem [resolvable:$true] %s206_s7 }
  0x14   : > { %s1537_s8 = smov [#allocation9]   ;;  %s1538_s11 = smov [#allocation11]  }
  0x15   : > { %s1912_s29 = scalar_select %p1627_p8, 1, 0 }
  0x16   : > { %p1238_p10 = pneg %p1627_p8  ;;  %s216_s9 = sshll.u32 %s1537_s8, 4  ;;  %s217_s9 = int_to_ptr.vmem [resolvable:$true] %s216_s9 }
  0x17   : > { %s229_s12 = sshll.u32 %s1538_s11, 4  ;;  %s1335_s13 = scalar_lea.vmem %s207_s7, 128  ;;  %s230_s12 = int_to_ptr.vmem [resolvable:$true] %s229_s12 }
  0x18   : > { %p1636_p11 = pnand %p1238_p10, %p1903_p1  ;;  %p1336_p13 = scmp.ne.s32.totalorder %s207_s7, %s1335_s13 }
  0x19   : > { %p1343_p5 = scmp.lt.s32.totalorder %s207_s7, %s207_s7  ;;  %p1344_p7 = scmp.lt.s32.totalorder %s1335_s13, %s1335_s13 }
  0x1a   : > { %p1326_p12 = pneg %p1636_p11 }
  0x1b   : > { %p1345_p9 = por %p1344_p7, %p1343_p5 }
  0x1c   : > { %p1338_p0 = pnand %p1336_p13, %p1326_p12 }
  0x1e   : > { %p1339_p3 = pneg %p1338_p0 }
  0x20   : > { %p1346_p10 = pnand %p1345_p9, %p1339_p3 }
  0x22   : > { %1349 = shalt.err (!%p1346_p10)
}
  0x23   : > { %s1914_s2 = sld [smem:[#allocation18_spill]]  ;;  %s1361_s16 = scalar_lea.vmem %s217_s9, 512 }
  0x24   : > { %p1362_p1 = scmp.ne.s32.totalorder %s217_s9, %s1361_s16  ;;  %p1369_p13 = scmp.lt.s32.totalorder %s217_s9, %s217_s9 }
  0x25   : > { %p1370_p0 = scmp.lt.s32.totalorder %s1361_s16, %s1361_s16 }
  0x26   : > { %p1364_p2 = pnand %p1362_p1, %p1326_p12 }
  0x27   : > { %p1371_p4 = por %p1370_p0, %p1369_p13 }
  0x28   : > { %p1365_p6 = pneg %p1364_p2 }
  0x29   : > { %1241 = dma.hbm_to_vmem [thread:$0]  (!%p1636_p11), %s1914_s2, 128, %s207_s7, [#allocation7]  }
  0x2a   : > { %p1372_p8 = pnand %p1371_p4, %p1365_p6 }
  0x2c   : > { %1375 = shalt.err (!%p1372_p8)
}
  0x2d   : > { %s1539_s17 = smov 128   ;;  %s1540_s18 = smov 8  }
  0x2e   : > { %s1915_s3 = sld [smem:[#allocation19_spill]]  ;;  %s1387_s26 = scalar_lea.vmem %s230_s12, 512 }
  0x2f   : > { %p1388_p9 = scmp.ne.s32.totalorder %s230_s12, %s1387_s26  ;;  %p1395_p3 = scmp.lt.s32.totalorder %s230_s12, %s230_s12 }
  0x30   : > { %p1396_p5 = scmp.lt.s32.totalorder %s1387_s26, %s1387_s26 }
  0x31   : > { %p1390_p1 = pnand %p1388_p9, %p1326_p12 }
  0x32   : > { %p1397_p4 = por %p1396_p5, %p1395_p3 }
  0x33   : > { %p1391_p2 = pneg %p1390_p1 }
  0x34   : > { %1244 = dma.hbm_to_vmem [thread:$0]  (!%p1636_p11), %s1915_s3, 512, %s217_s9, [#allocation10], %s1539_s17, %s1539_s17, %s1540_s18  }
  0x35   : > { %p1398_p6 = pnand %p1397_p4, %p1391_p2 }
  0x37   : > { %1401 = shalt.err (!%p1398_p6)
}
  0x38   : > { %s1916_s4 = sld [smem:[#allocation20_spill]]  ;;  %s1667_s8 = sadd.s32 1, %s1534_s24  }
  0x39   : > { %s30_s9 = ssub.s32 %s1534_s24, %s1667_s8  ;;  %s33_s10 = sadd.s32 1, %s1530_s23 }
  0x3a   : > { %p31_p8 = scmp.eq.s32.totalorder %s30_s9, 0  ;;  %p40_p12 = scmp.ne.s32.totalorder %s1530_s23, %s1526_s22 }
  0x3b   : > { %p41_p7 = scmp.eq.s32.totalorder %s1534_s24, 0  ;;  %p1262_p10 = scmp.lt.s32.totalorder %s1534_s24, 2 }
  0x3c   : > { %s1677_s11 = scalar_select %p31_p8, %s1530_s23, %s33_s10  }
  0x3d   : > { %p42_p13 = por %p41_p7, %p40_p12  ;;  %p1917_p0 = scmp.eq.s32.totalorder %s1608_s25, 1 }
  0x3e   : > { %1247 = dma.hbm_to_vmem [thread:$0]  (!%p1636_p11), %s1916_s4, 512, %s230_s12, [#allocation10], %s1539_s17, %s1539_s17, %s1540_s18  }
  0x3f   : > { %p1681_p9 = por %p1917_p0, %p40_p12  ;;  %s246_s14 = sand.u32 1, %s1530_s23  }
  0x40   : > { %s1130_s15 = sshll.u32 %s1534_s24, 7  ;;  %s1687_s12 = sshll.u32 %s246_s14, 3 }
  0x41   : > { %s1918_s13 = scalar_select %p1681_p9, 1, 0 }
  0x42   : > { %s1692_s18 = scalar_lea.hbm %s1896_s0, %s1130_s15  ;;  %s250_s19 = scalar_lea.vmem [#allocation3], %s1687_s12 }
  0x43   : > { %s257_s20 = sshll.u32 %s250_s19, 4  ;;  %p1695_p11 = pnand %p1262_p10, %p42_p13  ;;  %s258_s20 = int_to_ptr.vmem [resolvable:$true] %s257_s20 }
  0x44   : > { %s1702_s9 = scalar_lea.hbm %s1897_s1, %s1130_s15  ;;  %s247_s10 = scalar_lea.sflag [#allocation4], %s246_s14 }
  0x45   : > { %s1402_s16 = scalar_lea.hbm %s1692_s18, 128  ;;  %p1404_p2 = pneg %p1695_p11 }
  0x46   : > { %p1403_p1 = scmp.ne.s32.totalorder %s1692_s18, %s1402_s16  ;;  %s1407_s2 = scalar_lea.hbm %s1896_s0, 256 }
  0x47   : > { %p1408_p4 = scmp.lt.s32.totalorder %s1692_s18, %s1896_s0  ;;  %p1409_p6 = scmp.lt.s32.totalorder %s1407_s2, %s1402_s16 }
  0x48   : > { %p1405_p3 = pnand %p1404_p2, %p1403_p1 }
  0x49   : > { %p1410_p8 = por %p1409_p6, %p1408_p4 }
  0x4a   : > { %p1406_p5 = pneg %p1405_p3 }
  0x4c   : > { %p1411_p12 = pnand %p1410_p8, %p1406_p5 }
  0x4e   : > { %1414 = shalt.err (!%p1411_p12)
}
  0x4f   : > { %s1415_s14 = scalar_lea.vmem %s258_s20, 128  ;;  %s1541_s15 = smov [#allocation3]  }
  0x50   : > { %p1416_p7 = scmp.ne.s32.totalorder %s258_s20, %s1415_s14  ;;  %s1420_s30 = sshll.u32 %s1541_s15, 4  ;;  %s1421_s30 = int_to_ptr.vmem [resolvable:$false] %s1420_s30 }
  0x51   : > { %s1422_s7 = scalar_lea.vmem %s1421_s30, 256  ;;  %p1423_p0 = scmp.lt.s32.totalorder %s258_s20, %s1421_s30 }
  0x52   : > { %p1418_p10 = pnand %p1416_p7, %p1404_p2  ;;  %p1424_p1 = scmp.lt.s32.totalorder %s1422_s7, %s1415_s14 }
  0x54   : > { %p1419_p13 = pneg %p1418_p10  ;;  %p1425_p3 = por %p1424_p1, %p1423_p0 }
  0x56   : > { %p1426_p9 = pnand %p1425_p3, %p1419_p13 }
  0x58   : > { %1429 = shalt.err (!%p1426_p9)
}
  0x59   : > { %1251 = dma.hbm_to_vmem [thread:$0]  (!%p1695_p11), %s1692_s18, 128, %s258_s20, %s247_s10  }
  0x5a   : > { %s264_s2 = sand.u32 1, %s1534_s24   ;;  %s268_s3 = scalar_lea.vmem [#allocation6], %s1687_s12 }
  0x5b   : > { %s275_s4 = sshll.u32 %s268_s3, 4  ;;  %s265_s16 = scalar_lea.sflag [#allocation7], %s264_s2  ;;  %s276_s4 = int_to_ptr.vmem [resolvable:$true] %s275_s4 }
  0x5c   : > { %s1430_s17 = scalar_lea.hbm %s1702_s9, 128  ;;  %s1435_s15 = scalar_lea.hbm %s1897_s1, 256 }
  0x5d   : > { %p1431_p5 = scmp.ne.s32.totalorder %s1702_s9, %s1430_s17  ;;  %p1436_p6 = scmp.lt.s32.totalorder %s1702_s9, %s1897_s1 }
  0x5e   : > { %p1437_p8 = scmp.lt.s32.totalorder %s1435_s15, %s1430_s17 }
  0x5f   : > { %p1433_p9 = pnand %p1431_p5, %p1404_p2 }
  0x60   : > { %p1438_p12 = por %p1437_p8, %p1436_p6 }
  0x61   : > { %p1434_p4 = pneg %p1433_p9 }
  0x63   : > { %p1439_p7 = pnand %p1438_p12, %p1434_p4 }
  0x65   : > { %1442 = shalt.err (!%p1439_p7)
}
  0x66   : > { %s1443_s12 = scalar_lea.vmem %s276_s4, 128  ;;  %s1542_s18 = smov [#allocation6]  }
  0x67   : > { %p1444_p10 = scmp.ne.s32.totalorder %s276_s4, %s1443_s12  ;;  %s1448_s20 = sshll.u32 %s1542_s18, 4  ;;  %s1449_s20 = int_to_ptr.vmem [resolvable:$false] %s1448_s20 }
  0x68   : > { %s1450_s10 = scalar_lea.vmem %s1449_s20, 256  ;;  %p1451_p1 = scmp.lt.s32.totalorder %s276_s4, %s1449_s20 }
  0x69   : > { %p1446_p13 = pnand %p1444_p10, %p1404_p2  ;;  %p1452_p3 = scmp.lt.s32.totalorder %s1450_s10, %s1443_s12 }
  0x6b   : > { %p1447_p0 = pneg %p1446_p13  ;;  %p1453_p5 = por %p1452_p3, %p1451_p1 }
  0x6d   : > { %p1454_p9 = pnand %p1453_p5, %p1447_p0 }
  0x6f   : > { %1457 = shalt.err (!%p1454_p9)
}
  0x70   : > { %1254 = dma.hbm_to_vmem [thread:$0]  (!%p1695_p11), %s1702_s9, 128, %s276_s4, %s265_s16  }
  0x71   : > { %p1920_p4 = scmp.ne.s32.totalorder %s1912_s29, 0 }
  0x72   : > { %s1747_s2 = sand.u32 (!%p1920_p4), 1, %s1526_s22   ;;  %p1921_p2 = scmp.ne.s32.totalorder (!%p1920_p4), %s1910_s27, 0 }
  0x73   : > { %284 = sbr.rel (%p1920_p4) target bundleno = 2314 (0x90a), region = 44  ;;  %s1750_s3 = sshll.u32 (!%p1920_p4), %s1747_s2, 3 }
  0x74   : > { %s287_s17 = scalar_lea.sflag (!%p1920_p4), [#allocation4], %s1747_s2  ;;  %s290_s19 = scalar_lea.vmem (!%p1920_p4), [#allocation3], %s1750_s3 }
  0x78   : > { %1501 = dma.done.wait (%p1921_p2), %s287_s17, 128  }
  0x79   : > { %1503 = vsyncadd (%p1921_p2), %s287_s17, 4294967168  ;;  %s295_s29 = sand.u32 1, %s1608_s25   ;;  %s299_s9 = scalar_lea.vmem [#allocation6], %s1750_s3 }
  0x7a   : > { %s296_s26 = scalar_lea.sflag [#allocation7], %s295_s29 }
  0x7b   : > { %1505 = dma.done.wait (%p1921_p2), %s296_s26, 128  }
  0x7c   : > { %1507 = vsyncadd (%p1921_p2), %s296_s26, 4294967168  ;;  %p1922_p11 = scmp.eq.s32.totalorder %s1608_s25, 0 }
  0x7e   : > { %1509 = dma.done.wait (%p1922_p11), [#allocation7], 128   ;;  %p1923_p6 = pmov %p1922_p11 }
  0x80   : > { %1511 = vsyncadd (%p1923_p6), [#allocation7], 4294967168  ;;  %p1924_p8 = pmov %p1923_p6 }
  0x81   : > { %p1925_p12 = pmov %p1923_p6 }
  0x82   : > { %1513 = dma.done.wait (%p1924_p8), [#allocation10], 1024  }
  0x83   : > { %1515 = vsyncadd (%p1925_p12), [#allocation10], 4294966272  ;;  %v1543_v0 = vmov 0.0   ;;  %vm1544_vm0 = vmmov 0   ;;  %v458_v1 = vld [vmem:[#allocation9 + $0x18] sm:$0xff]  ;;  %v457_v2 = vld [vmem:[#allocation9 + $0x10] sm:$0xff]  ;;  %v423_v7 = vlaneseq }
  0x84   : > { %1178 = vmatprep.subr.mxu1 %v1543_v0  ;;  %1186 = vmatprep.mubr.msk.f32.mxu1 %vm1544_vm0, %v1543_v0  ;;  %v1778_v3 = vld [vmem:[%s290_s19] sm:$0xff]  ;;  %v456_v4 = vld [vmem:[#allocation9 + $0x8] sm:$0xff]  ;;  %vm430_vm1 = vcmask 261120   ;;  %vm348_vm2 = vcmask 64512   ;;  %v1799_v10 = vld [vmem:[%s1901_s5] sm:$0xff]  ;;  %s1545_s16 = smov 64  }
  0x85   : > { %1173 = vmatprep.subr.mxu0 %v1543_v0  ;;  %1175 = vmatprep.mubr.msk.f32.mxu0 %vm1544_vm0, %v1543_v0  ;;  %v455_v5 = vld [vmem:[#allocation9] sm:$0xff]  ;;  %v347_v6 = vld [vmem:[#allocation8] sm:$0xff]  ;;  %v1793_v8 = vshrl.u32 %v423_v7, 7  ;;  %s1546_s14 = smov 96   ;;  %s1547_s15 = smov 80   ;;  %vm540_vm3 = vcmask 130048  }
  0x86   : > { %1179 = vmatpush3.msra.mxu1 %v458_v1  ;;  %1174 = vmatpush3.msra.mxu0 %v1778_v3  ;;  %v536_v20 = vld [vmem:[%s299_s9] sm:$0xff]  ;;  %s1548_s30 = smov 112   ;;  %s1549_s7 = smov 48   ;;  %v882_v51 = vld [vmem:[#allocation11 + $0x18] sm:$0xff]  ;;  %v879_v54 = vld [vmem:[#allocation11] sm:$0xff]  ;;  %vm876_vm4 = vcmask 261248  }
  0x87   : > { %1180 = vmatprep.subr.mxu1 %v1543_v0  ;;  %1189 = vmatprep.subr.mxu0 %v1543_v0  ;;  %v461_v9 = vsub.s32 0, %v1793_v8  ;;  %v881_v52 = vld [vmem:[#allocation11 + $0x10] sm:$0xff]  ;;  %v880_v53 = vld [vmem:[#allocation11 + $0x8] sm:$0xff]  ;;  %s1550_s12 = smov 16   ;;  %v425_v57 = vsub.s32 6, %v1793_v8  ;;  %s1150_s18 = sshll.u32 %s1608_s25, 7 }
  0x88   : > { %1181 = vmatpush3.msra.mxu1 %v457_v2  ;;  %1176 = vmatmul.mubr.msk.f32.vlgmr.msra.gmra.mxu0 %vm348_vm2, %v347_v6  ;;  %v885_v2 = vsub.s32 1, %v1793_v8  ;;  %s344_s20 = scalar_lea.vmem [#allocation12], %s1750_s3  ;;  %s1000_s29 = scalar_lea.hbm %s1902_s6, %s1150_s18 }
  0x89   : > { %1182 = vmatprep.subr.mxu1 %v1543_v0  ;;  %1191 = vmatprep.mubr.msk.f32.mxu0 %vm1544_vm0, %v1543_v0  ;;  %v462_v11 = vrot.slane %v1799_v10, %v461_v9  ;;  %v426_v59 = vrot.slane %v1799_v10, %v425_v57  ;;  %s1002_s10 = sshll.u32 %s344_s20, 4  ;;  %s989_s26 = scalar_lea.sflag [#allocation5], %s1747_s2  ;;  %s1003_s10 = int_to_ptr.vmem [resolvable:$true] %s1002_s10 }
  0x8a   : > { %1183 = vmatpush3.msra.mxu1 %v456_v4  ;;  %v886_v6 = vrot.slane %v1799_v10, %v885_v2  ;;  %s1458_s9 = scalar_lea.vmem %s1003_s10, 128  ;;  %p1926_p10 = scmp.ne.s32.totalorder %s1918_s13, 0 }
  0x8b   : > { %1184 = vmatprep.subr.mxu1 %v1543_v0  ;;  %p1459_p7 = scmp.ne.s32.totalorder %s1003_s10, %s1458_s9  ;;  %s1551_s27 = smov [#allocation12]  }
  0x8c   : > { %1185 = vmatpush3.msra.mxu1 %v455_v5  ;;  %s1462_s25 = sshll.u32 %s1551_s27, 4  ;;  %s1463_s25 = int_to_ptr.vmem [resolvable:$false] %s1462_s25 }
  0x8d   : > { %1187 = vmatmul.mubr.msk.f32.vlgmr.msra.gmra.mxu1 %vm430_vm1, %v1778_v3  ;;  %1209 = vmatprep.subr.mxu1 %v1543_v0  ;;  %p1460_p13 = pnand %p1459_p7, %p1926_p10  ;;  %s1464_s3 = scalar_lea.vmem %s1463_s25, 256 }
  0x8e   : > { %1217 = vmatprep.mubr.msk.f32.mxu1 %vm1544_vm0, %v1543_v0  ;;  %1210 = vmatpush3.msra.mxu1 %v882_v51  ;;  %p1465_p1 = scmp.lt.s32.totalorder %s1003_s10, %s1463_s25  ;;  %p1466_p3 = scmp.lt.s32.totalorder %s1464_s3, %s1458_s9 }
  0x8f   : > { %1211 = vmatprep.subr.mxu1 %v1543_v0  ;;  %p1461_p0 = pneg %p1460_p13 }
  0x90   : > { %1212 = vmatpush3.msra.mxu1 %v881_v52  ;;  %p1467_p5 = por %p1466_p3, %p1465_p1 }
  0x91   : > { %1213 = vmatprep.subr.mxu1 %v1543_v0 }
  0x92   : > { %1214 = vmatpush3.msra.mxu1 %v880_v53  ;;  %p1468_p9 = pnand %p1467_p5, %p1461_p0 }
  0x93   : > { %1215 = vmatprep.subr.mxu1 %v1543_v0 }
  0x94   : > { %1216 = vmatpush3.msra.mxu1 %v879_v54 }
 0x148   : > { %v1807_v15 = vpop.f32.mrf.mxu0 }
 0x149   : > { %v422_v58 = vsub.f32 %v1778_v3, %v1807_v15 }
 0x14a   : > { %v1177_v16 = vpop.f32.mrf.mxu0 }
 0x14b   : > { %v427_v60 = vmul.f32 %v426_v59, %v422_v58 }
 0x14d   : > { %v532_v12 = vpop.f32.mrf.mxu1  ;;  %v428_v61 = vadd.f32 %v427_v60, %v1807_v15 }
 0x14e   : > { %v1802_v13 = vadd.f32 %v532_v12, %v462_v11 }
 0x14f   : > { %v1188_v14 = vpop.f32.mrf.mxu1  ;;  %v429_v62 = vadd.f32 %v428_v61, %v1778_v3 }
 0x150   : > { %628 = vrot.lane.b32.xlu1 %v1802_v13, %s1545_s16  ;;  %538 = vrot.lane.b32.xlu0 %v1802_v13, %s1546_s14 }
 0x151   : > { %v431_v63 = vsel %vm430_vm1, %v429_v62, 0.0 }
 0x154   : > { %707 = vrot.lane.b32.xlu1 %v1802_v13, %s1547_s15 }
 0x1c2   : > { %v539_v17 = vpop.permute.xlu0 %538  ;;  %v629_v18 = vpop.permute.xlu1 %628 }
 0x1c3   : > { %1190 = vmatpush3.xpose.msk.msra.mxu0 %vm540_vm3, %v539_v17 }
 0x1c4   : > { %1194 = vmatprep.subr.mxu0 %v1543_v0 }
 0x1c6   : > { %1192 = vmatmul.mubr.msk.f32.vlgmr.msra.gmra.mxu0 %vm540_vm3, %v1802_v13  ;;  %v708_v30 = vpop.permute.xlu1 %707 }
 0x1c7   : > { %1195 = vmatpush3.msra.mxu0 %v629_v18  ;;  %1196 = vmatprep.mubr.msk.f32.mxu0 %vm1544_vm0, %v1543_v0 }
 0x1c8   : > { %1199 = vmatprep.subr.mxu0 %v1543_v0 }
 0x286   : > { %v611_v19 = vpop.f32.mrf.mxu0 }
 0x287   : > { %v615_v21 = vmul.f32 0.25, %v611_v19 }
 0x288   : > { %v1193_v22 = vpop.f32.mrf.mxu0 }
 0x289   : > { %v616_v23 = vadd.f32 %v615_v21, %v536_v20 }
 0x28b   : > { %v617_v24 = vsel %vm348_vm2, %v616_v23, -inf }
 0x28c   : > { %618 = vmax.xlane.f32.xlu0 %v617_v24 }
 0x315   : > { %v619_v25 = vpop.xlane.xlu0 %618 }
 0x316   : > { %v620_v26 = vsub.f32 %v616_v23, %v619_v25 }
 0x318   : > { %v621_v27 = vmul.f32 1.442695, %v620_v26 }
 0x31a   : > { %1312 = vpow2.f32 %v621_v27  ;;  %v447_v27 = vsub.s32 4, %v1793_v8 }
 0x327   : > { %v1313_v28 = vpop.eup %1312 }
 0x328   : > { %v623_v29 = vsel %vm348_vm2, %v1313_v28, 0.0 }
 0x329   : > { %624 = vadd.xlane.f32.xlu1 %v623_v29  ;;  %v448_v29 = vrot.slane %v1799_v10, %v447_v27 }
 0x33a   : > { %705 = vrot.lane.b32.xlu1 %v1802_v13, %s1548_s30 }
 0x3b2   : > { %v625_v31 = vpop.xlane.xlu1 %624 }
 0x3b3   : > { %1314 = vrcp.f32 %v625_v31  ;;  %v976_v31 = vsub.s32 2, %v1793_v8 }
 0x3b6   : > { %v706_v34 = vpop.permute.xlu1 %705 }
 0x3c0   : > { %v1315_v32 = vpop.eup %1314 }
 0x3c1   : > { %v627_v33 = vmul.f32 %v1315_v32, %v1313_v28  ;;  %v452_v32 = vsub.s32 5, %v1793_v8 }
 0x3c3   : > { %1197 = vmatmul.mubr.msk.f32.vlgmr.msra.gmra.mxu0 %vm348_vm2, %v627_v33  ;;  %v981_v33 = vsub.s32 3, %v1793_v8 }
 0x3c4   : > { %1200 = vmatpush3.xpose.msk.msra.mxu0 %vm540_vm3, %v708_v30  ;;  %1201 = vmatprep.mubr.msk.f32.mxu0 %vm1544_vm0, %v1543_v0 }
 0x3c5   : > { %1204 = vmatprep.subr.mxu0 %v1543_v0 }
 0x3c7   : > { %1202 = vmatmul.mubr.msk.f32.vlgmr.msra.gmra.mxu0 %vm540_vm3, %v706_v34 }
 0x3c8   : > { %1206 = vmatprep.mubr.msk.f32.mxu0 %vm1544_vm0, %v1543_v0 }
 0x483   : > { %v700_v35 = vpop.f32.mrf.mxu0 }
 0x484   : > { %704 = vst.msk [vmem:[#allocation2] sm:$0xff] %vm540_vm3, %v700_v35  ;;  %v977_v35 = vrot.slane %v1799_v10, %v976_v31 }
 0x485   : > { %v1198_v36 = vpop.f32.mrf.mxu0 }
 0x486   : > { %v453_v36 = vrot.slane %v1799_v10, %v452_v32 }
 0x487   : > { %v779_v37 = vpop.f32.mrf.mxu0 }
 0x488   : > { %v783_v38 = vmul.f32 0.25, %v779_v37 }
 0x489   : > { %v1203_v39 = vpop.f32.mrf.mxu0 }
 0x48a   : > { %v784_v40 = vadd.f32 %v783_v38, %v536_v20  ;;  %v982_v39 = vrot.slane %v1799_v10, %v981_v33 }
 0x48c   : > { %v785_v41 = vsel %vm348_vm2, %v784_v40, -inf }
 0x48d   : > { %786 = vmax.xlane.f32.xlu1 %v785_v41 }
 0x516   : > { %v787_v42 = vpop.xlane.xlu1 %786 }
 0x517   : > { %v788_v43 = vsub.f32 %v784_v40, %v787_v42 }
 0x519   : > { %v789_v44 = vmul.f32 1.442695, %v788_v43 }
 0x51b   : > { %1316 = vpow2.f32 %v789_v44 }
 0x528   : > { %v1317_v45 = vpop.eup %1316 }
 0x529   : > { %v791_v46 = vsel %vm348_vm2, %v1317_v45, 0.0 }
 0x52a   : > { %792 = vadd.xlane.f32.xlu0 %v791_v46 }
 0x540   : > { %796 = vrot.lane.b32.xlu0 %v1802_v13, %s1549_s7 }
 0x5b3   : > { %v793_v47 = vpop.xlane.xlu0 %792 }
 0x5b4   : > { %1318 = vrcp.f32 %v793_v47 }
 0x5b7   : > { %v797_v48 = vpop.permute.xlu0 %796 }
 0x5b8   : > { %1205 = vmatpush3.msra.mxu0 %v797_v48 }
 0x5c1   : > { %v1319_v49 = vpop.eup %1318 }
 0x5c2   : > { %v795_v50 = vmul.f32 %v1319_v49, %v1317_v45 }
 0x5c4   : > { %1207 = vmatmul.mubr.msk.f32.vlgmr.msra.gmra.mxu0 %vm348_vm2, %v795_v50 }
 0x684   : > { %v868_v55 = vpop.f32.mrf.mxu0 }
 0x685   : > { %873 = vrot.lane.b32.xlu0 %v868_v55, %s1550_s12 }
 0x686   : > { %v1208_v56 = vpop.f32.mrf.mxu0 }
 0x6a4   : > { %432 = vadd.xlane.f32.xlu0 %v431_v63 }
 0x6f7   : > { %v874_v0 = vpop.permute.xlu0 %873 }
 0x6f8   : > { %877 = vst.msk [vmem:[#allocation2] sm:$0xff] %vm876_vm4, %v874_v0 }
 0x6ff   : > { %v878_v1 = vld [vmem:[#allocation2] sm:$0xff] }
 0x700   : > { %1218 = vmatmul.mubr.msk.f32.vlgmr.msra.gmra.mxu1 %vm430_vm1, %v878_v1 }
 0x72d   : > { %v433_v4 = vpop.xlane.xlu0 %432 }
 0x72e   : > { %v435_v5 = vmul.f32 0.03125, %v433_v4 }
 0x730   : > { %v436_v9 = vsub.f32 %v429_v62, %v435_v5 }
 0x732   : > { %v437_v15 = vmul.f32 %v436_v9, %v436_v9 }
 0x734   : > { %v438_v16 = vsel %vm430_vm1, %v437_v15, 0.0 }
 0x7c0   : > { %v956_v7 = vpop.f32.mrf.mxu1 }
 0x7c1   : > { %v957_v11 = vadd.f32 %v956_v7, %v886_v6 }
 0x7c2   : > { %v1219_v12 = vpop.f32.mrf.mxu1 }
 0x7c3   : > { %v960_v13 = vadd.f32 %v957_v11, %v1778_v3 }
 0x7c5   : > { %v961_v14 = vsel %vm430_vm1, %v960_v13, 0.0 }
 0x7c6   : > { %962 = vadd.xlane.f32.xlu1 %v961_v14 }
 0x7ca   : > { %439 = vadd.xlane.f32.xlu1 %v438_v16 }
 0x84f   : > { %v963_v17 = vpop.xlane.xlu1 %962 }
 0x850   : > { %v964_v18 = vmul.f32 0.03125, %v963_v17 }
 0x852   : > { %v965_v19 = vsub.f32 %v960_v13, %v964_v18 }
 0x853   : > { %v440_v22 = vpop.xlane.xlu1 %439 }
 0x854   : > { %v966_v20 = vmul.f32 %v965_v19, %v965_v19  ;;  %v441_v23 = vmul.f32 0.03125, %v440_v22 }
 0x856   : > { %v967_v21 = vsel %vm430_vm1, %v966_v20, 0.0  ;;  %v442_v24 = vadd.f32 1e-12, %v441_v23 }
 0x857   : > { %968 = vadd.xlane.f32.xlu1 %v967_v21 }
 0x858   : > { %1320 = vrsqrt.f32 %v442_v24 }
 0x865   : > { %v1321_v28 = vpop.eup %1320 }
 0x866   : > { %v444_v30 = vmul.f32 %v1321_v28, %v436_v9 }
 0x868   : > { %v449_v34 = vmul.f32 %v448_v29, %v444_v30 }
 0x86a   : > { %v454_v41 = vadd.f32 %v453_v36, %v449_v34 }
 0x86c   : > { %v984_v43 = vmul.f32 0.7, %v454_v41 }
 0x8e0   : > { %v969_v25 = vpop.xlane.xlu1 %968 }
 0x8e1   : > { %v970_v3 = vmul.f32 0.03125, %v969_v25 }
 0x8e3   : > { %v971_v26 = vadd.f32 1e-12, %v970_v3 }
 0x8e5   : > { %1322 = vrsqrt.f32 %v971_v26 }
 0x8f2   : > { %v1323_v37 = vpop.eup %1322 }
 0x8f3   : > { %v973_v38 = vmul.f32 %v1323_v37, %v965_v19 }
 0x8f5   : > { %v978_v40 = vmul.f32 %v977_v35, %v973_v38 }
 0x8f7   : > { %v983_v42 = vadd.f32 %v982_v39, %v978_v40 }
 0x8f9   : > { %v985_v44 = vmul.f32 0.3, %v983_v42 }
 0x8fb   : > { %v986_v8 = vadd.f32 %v985_v44, %v984_v43 }
 0x8fd   : > { %987 = vst.msk [vmem:[%s344_s20] sm:$0xff] %vm430_vm1, %v986_v8 }
 0x8fe   : > { %1471 = shalt.err (!%p1468_p9)
}
 0x8ff   : > { %s1472_s4 = scalar_lea.hbm %s1000_s29, 128  ;;  %s1476_s14 = scalar_lea.hbm %s1902_s6, 256 }
 0x900   : > { %p1473_p4 = scmp.ne.s32.totalorder %s1000_s29, %s1472_s4  ;;  %p1477_p6 = scmp.lt.s32.totalorder %s1000_s29, %s1902_s6 }
 0x901   : > { %p1478_p8 = scmp.lt.s32.totalorder %s1476_s14, %s1472_s4 }
 0x902   : > { %p1474_p2 = pnand %p1473_p4, %p1926_p10 }
 0x903   : > { %p1479_p12 = por %p1478_p8, %p1477_p6 }
 0x904   : > { %p1475_p11 = pneg %p1474_p2 }
 0x906   : > { %p1480_p7 = pnand %p1479_p12, %p1475_p11 }
 0x908   : > { %1483 = shalt.err (!%p1480_p7)
}
 0x909   : > { %1236 = dma.vmem_to_hbm [thread:$0]  (%p1926_p10), %s1003_s10, 128, %s1000_s29, %s989_s26  }
 0x90a PF: > { %s1014_s7 = sand.u32 1, %s1522_s21   ;;  %p1927_p13 = scmp.ne.s32.totalorder %s1911_s28, 0 }
 0x90b   : > { %p1928_p0 = scmp.ge.s32.totalorder %s1534_s24, 2  ;;  %s1015_s12 = scalar_lea.sflag [#allocation5], %s1014_s7 }
 0x90d   : > { %p1256_p1 = pnand %p1928_p0, %p1927_p13 }
 0x90f   : > { %p1257_p3 = pneg %p1256_p1 }
 0x911   : > { %1517 = dma.done.wait (%p1257_p3), %s1015_s12, 128  }
 0x912   : > { %1519 = vsyncadd (%p1257_p3), %s1015_s12, 4294967168  ;;  %p23_p5 = scmp.ge.s32.totalorder %s1667_s8, 4   ;;  %s1929_s21 = smov %s1526_s22 }
 0x913   : > { %s1930_s22 = smov %s1530_s23  ;;  %s1931_s23 = smov %s1677_s11 }
 0x914   : > { %s1932_s24 = smov %s1667_s8  ;;  %25 = sbr.rel (!%p23_p5) target bundleno = 12 (0xc), region = 114 }
 0x919   :  { %1020 = vsyncpa [#allocation4], 1 }
 0x91a   :  { %1022 = vsyncpa [#allocation4 + $0x1], 1 }
 0x91b   :  { %1023 = vsyncpa [#allocation7], 1 }
 0x91c   :  { %1025 = vsyncpa [#allocation7 + $0x1], 1 }
 0x91d   :  { %1026 = vsyncpa [#allocation10], 1 }
 0x91e   :  { %1027 = vsyncpa [#allocation5], 1 }
 0x91f   :  { %1029 = vsyncpa [#allocation5 + $0x1], 1 }

</bundles_post_ra>
